<compile_context>
chip_gen: v7x
topology: tpu7x:2x2x1
jax: 0.10.0
libtpu: 0.0.40
codegen_flags: <defaults>
</compile_context>

<pallas_src>
import functools

import jax
import jax.numpy as jnp
from jax import lax
from jax.experimental import pallas as pl
from jax.experimental.pallas import tpu as pltpu


def _round_up(x, m):
    return ((x + m - 1) // m) * m


def _iou_squares(b_cx, b_cy, b_s, p_cx, p_cy, p_s):
    """IoU between M object squares (cols) and TP prior squares (rows) -> (M, TP)."""
    inter_w = jnp.maximum(
        0.0,
        jnp.minimum(b_cx + 0.5 * b_s, p_cx + 0.5 * p_s)
        - jnp.maximum(b_cx - 0.5 * b_s, p_cx - 0.5 * p_s))
    inter_h = jnp.maximum(
        0.0,
        jnp.minimum(b_cy + 0.5 * b_s, p_cy + 0.5 * p_s)
        - jnp.maximum(b_cy - 0.5 * b_s, p_cy - 0.5 * p_s))
    inter = inter_w * inter_h
    union = b_s * b_s + p_s * p_s - inter
    # exact divide: keeps the IoU-threshold comparison semantics exact
    return inter / union


# ---------------------------------------------------------------------------
# Kernel A: globally best prior for every object, accumulated across P tiles.
# ---------------------------------------------------------------------------
def _best_prior_kernel(boxes_ref, priors_ref, pfo_ref, bestov_ref, bestidx_ref,
                       *, p_real, tile_p):
    t = pl.program_id(1)

    @pl.when(t == 0)
    def _():
        bestov_ref[...] = jnp.full_like(bestov_ref, -2.0)
        bestidx_ref[...] = jnp.zeros_like(bestidx_ref)

    boxes = boxes_ref[...]                       # (M, 3)
    priors = priors_ref[...]                     # (3, TP)
    M = boxes.shape[0]
    TP = priors.shape[1]

    iou = _iou_squares(boxes[:, 0:1], boxes[:, 1:2], boxes[:, 2:3],
                       priors[0:1, :], priors[1:2, :], priors[2:3, :])   # (M, TP)
    lane = lax.broadcasted_iota(jnp.int32, (M, TP), 1) + t * tile_p      # global prior idx
    iou = jnp.where(lane < p_real, iou, -1.0)                            # mask padded priors

    tile_max = jnp.max(iou, axis=1, keepdims=True)                       # (M, 1)
    tile_arg = jnp.min(jnp.where(iou == tile_max, lane, jnp.int32(2 ** 30)),
                       axis=1, keepdims=True)                            # first max in tile
    better = tile_max > bestov_ref[...]
    bestidx_ref[...] = jnp.where(better, tile_arg, bestidx_ref[...])
    bestov_ref[...] = jnp.where(better, tile_max, bestov_ref[...])

    @pl.when(t == pl.num_programs(1) - 1)
    def _():
        pfo_ref[...] = bestidx_ref[...]


# ---------------------------------------------------------------------------
# Kernel B: matching + per-prior CE + fused positive-loc-L1 / conf_pos / n_pos.
# ---------------------------------------------------------------------------
def _match_loss_kernel(n_obj_ref, boxes_ref, pfo_ref, bl4_ref,
                       priors_ref, scores_ref, pred_ref,
                       conf_ref, stats_ref,
                       loc_acc, cpos_acc, npos_acc,
                       *, threshold, p_real, tile_p):
    b = pl.program_id(0)
    t = pl.program_id(1)

    @pl.when(t == 0)
    def _():
        loc_acc[...] = jnp.zeros_like(loc_acc)
        cpos_acc[...] = jnp.zeros_like(cpos_acc)
        npos_acc[...] = jnp.zeros_like(npos_acc)

    n_obj = n_obj_ref[b]                         # scalar int32 (SMEM prefetch)
    boxes = boxes_ref[...]                       # (M, 3)
    pfo = pfo_ref[...]                           # (M, 1) best global prior per object
    bl4 = bl4_ref[...]                           # (4, M) rows: cx, cy, s, label
    priors = priors_ref[...]                     # (3, TP)
    scores = scores_ref[...]                     # (C, TP)
    pred = pred_ref[...]                         # (3, TP)

    M = boxes.shape[0]
    TP = priors.shape[1]
    C = scores.shape[0]

    b_cx = boxes[:, 0:1]; b_cy = boxes[:, 1:2]; b_s = boxes[:, 2:3]      # (M, 1)
    p_cx = priors[0:1, :]; p_cy = priors[1:2, :]; p_s = priors[2:3, :]   # (1, TP)

    iou = _iou_squares(b_cx, b_cy, b_s, p_cx, p_cy, p_s)                 # (M, TP)

    obj_iota = lax.broadcasted_iota(jnp.int32, (M, TP), 0)
    lane = lax.broadcasted_iota(jnp.int32, (M, TP), 1) + t * tile_p
    lane_row = lax.broadcasted_iota(jnp.int32, (1, TP), 1) + t * tile_p
    valid_obj = obj_iota < n_obj
    vprior = lane_row < p_real                                           # (1, TP)
    overlap = jnp.where(valid_obj & (lane < p_real), iou, -1.0)

    # best object per prior (first-max over object axis)
    ov_prior = jnp.max(overlap, axis=0, keepdims=True)                   # (1, TP)
    obj_for_prior = jnp.min(jnp.where(overlap == ov_prior, obj_iota, M),
                            axis=0, keepdims=True)                       # (1, TP)

    # force-match each valid object to its globally best prior (last object wins)
    match = (lane == pfo) & valid_obj                                    # (M, TP)
    best_j = jnp.max(jnp.where(match, obj_iota, -1), axis=0, keepdims=True)
    has_match = best_j >= 0
    obj_for_prior = jnp.where(has_match, best_j, obj_for_prior)
    ov_prior = jnp.where(has_match, jnp.float32(1.0), ov_prior)

    onehot_f = (obj_for_prior == obj_iota).astype(jnp.float32)           # (M, TP)

    # fused one-hot gather of [cx, cy, s, label] on the MXU (exact for 0/1 RHS
    # at HIGHEST precision).
    gathered = jnp.dot(bl4, onehot_f, preferred_element_type=jnp.float32,
                       precision=lax.Precision.HIGHEST)                  # (4, TP)
    mb_cx = gathered[0:1, :]
    mb_cy = gathered[1:2, :]
    mb_s = gathered[2:3, :]
    label_prior = jnp.round(gathered[3:4, :]).astype(jnp.int32)          # (1, TP)
    label_prior = jnp.where(ov_prior < threshold, 0, label_prior)

    pos = (label_prior != 0) & vprior                                    # (1, TP)
    posf = pos.astype(jnp.float32)

    # encode loc targets (cxcy_to_gcxgcy, SSD variances 10 / 5)
    inv_ps10 = 10.0 / p_s                                                # hoisted, shared
    g_cx = (mb_cx - p_cx) * inv_ps10
    g_cy = (mb_cy - p_cy) * inv_ps10
    g_s = jnp.log(jnp.maximum(mb_s, 1e-10) / p_s) * 5.0                  # clamp: no -inf
    tloc = jnp.concatenate([g_cx, g_cy, g_s], axis=0)                    # (3, TP)

    l1 = jnp.where(pos, jnp.abs(pred - tloc), 0.0)                       # (3, TP)
    loc_acc[...] = loc_acc[...] + jnp.sum(jnp.sum(l1, axis=1, keepdims=True),
                                          axis=0, keepdims=True)

    # per-prior cross entropy: logsumexp(scores) - scores[true_class]
    m = jnp.max(scores, axis=0, keepdims=True)
    lse = m + jnp.log(jnp.sum(jnp.exp(scores - m), axis=0, keepdims=True))
    cls_iota = lax.broadcasted_iota(jnp.int32, (C, TP), 0)
    picked = jnp.sum(jnp.where(cls_iota == label_prior, scores, 0.0),
                     axis=0, keepdims=True)
    ce = jnp.where(vprior, lse - picked, 0.0)                            # (1, TP)

    cpos_acc[...] = cpos_acc[...] + jnp.sum(jnp.where(pos, ce, 0.0),
                                            axis=1, keepdims=True)
    npos_acc[...] = npos_acc[...] + jnp.sum(posf, axis=1, keepdims=True)

    conf_ref[...] = jnp.where(pos, 0.0, ce)                              # negatives-only CE

    @pl.when(t == pl.num_programs(1) - 1)
    def _():
        sidx = lax.broadcasted_iota(jnp.int32, (1, 8), 1)
        stats_ref[...] = jnp.where(sidx == 0, loc_acc[...],
                         jnp.where(sidx == 1, cpos_acc[...],
                         jnp.where(sidx == 2, npos_acc[...], 0.0)))


# ---------------------------------------------------------------------------
# Kernel C: final reduction over tiny per-image tensors.
# ---------------------------------------------------------------------------
def _final_loss_kernel(stats_ref, topk_ref, out_ref, *, neg_pos_ratio, alpha):
    stats = stats_ref[...]                       # (B, 8) [loc_sum, conf_pos, n_pos, ...]
    topk = topk_ref[...]                         # (B, K) descending negative CE

    loc_sum = jnp.sum(stats[:, 0:1], axis=0, keepdims=True)              # (1, 1)
    conf_pos = jnp.sum(stats[:, 1:2], axis=0, keepdims=True)             # (1, 1)
    n_pos = stats[:, 2:3]                                                # (B, 1)
    n_pos_tot = jnp.sum(n_pos, axis=0, keepdims=True)                    # (1, 1)

    ranks = lax.broadcasted_iota(jnp.int32, topk.shape, 1)               # (B, K)
    nhn = (neg_pos_ratio * n_pos).astype(jnp.int32)                      # exact small ints
    hard = ranks < nhn
    conf_hard = jnp.sum(jnp.sum(jnp.where(hard, topk, 0.0), axis=1, keepdims=True),
                        axis=0, keepdims=True)                           # (1, 1)

    # guard: PyTorch reference divides by n_positives.sum() unguarded (NaN at 0).
    denom = jnp.maximum(n_pos_tot, 1.0)
    conf_loss = (conf_hard + conf_pos) / denom
    loc_loss = loc_sum / (3.0 * denom)           # L1Loss(mean) over (N_pos, 3) elements
    out_ref[...] = conf_loss + alpha * loc_loss


def multibox_loss(predicted_locs, predicted_scores, boxes, labels, n_objects,
                  priors_cxcy, threshold=0.5, neg_pos_ratio=3, alpha=1.0):
    B, P, _ = predicted_locs.shape
    C = predicted_scores.shape[2]
    M = boxes.shape[1]

    # lane-dense padding of the prior axis + P tiling
    TILE_P = 512
    P_pad = _round_up(P, 128)
    if P_pad <= TILE_P:
        TILE_P = P_pad
    else:
        P_pad = _round_up(P_pad, TILE_P)
    n_pt = P_pad // TILE_P
    pad = P_pad - P

    boxes_f = boxes.astype(jnp.float32)                                   # (B, M, 3)
    bl4 = jnp.concatenate(
        [jnp.transpose(boxes_f, (0, 2, 1)),
         labels.astype(jnp.float32)[:, None, :]], axis=1)                 # (B, 4, M)

    priors_t = jnp.transpose(priors_cxcy.astype(jnp.float32), (1, 0))     # (3, P)
    priors_t = jnp.pad(priors_t, ((0, 0), (0, pad)), constant_values=1.0)  # s=1: no div-by-0
    # TODO(synk): the (B,P,C)->(B,C,P) transpose costs one extra HBM round trip of the
    #             largest tensor; kept so the class-axis CE reductions stay lane-dense.
    scores_t = jnp.pad(jnp.transpose(predicted_scores, (0, 2, 1)).astype(jnp.float32),
                       ((0, 0), (0, 0), (0, pad)))                        # (B, C, P_pad)
    pred_t = jnp.pad(jnp.transpose(predicted_locs, (0, 2, 1)).astype(jnp.float32),
                     ((0, 0), (0, 0), (0, pad)))                          # (B, 3, P_pad)
    n_obj_i = n_objects.astype(jnp.int32)

    # ---- pass 1: globally best prior per object ----
    pfo = pl.pallas_call(
        functools.partial(_best_prior_kernel, p_real=P, tile_p=TILE_P),
        grid_spec=pltpu.PrefetchScalarGridSpec(
            num_scalar_prefetch=0,
            grid=(B, n_pt),
            in_specs=[
                pl.BlockSpec((None, M, 3), lambda b, t: (b, 0, 0)),        # boxes
                pl.BlockSpec((3, TILE_P), lambda b, t: (0, t)),            # priors
            ],
            out_specs=pl.BlockSpec((None, M, 1), lambda b, t: (b, 0, 0)),
            scratch_shapes=[pltpu.VMEM((M, 1), jnp.float32),
                            pltpu.VMEM((M, 1), jnp.int32)]),
        out_shape=jax.ShapeDtypeStruct((B, M, 1), jnp.int32),
        compiler_params=pltpu.CompilerParams(
            dimension_semantics=("parallel", "arbitrary")),
    )(boxes_f, priors_t)

    # ---- pass 2: matching + CE + fused positive reductions ----
    grid_spec = pltpu.PrefetchScalarGridSpec(
        num_scalar_prefetch=1,                    # n_objects -> SMEM
        grid=(B, n_pt),
        in_specs=[
            pl.BlockSpec((None, M, 3), lambda b, t, n: (b, 0, 0)),         # boxes
            pl.BlockSpec((None, M, 1), lambda b, t, n: (b, 0, 0)),         # best prior/object
            pl.BlockSpec((None, 4, M), lambda b, t, n: (b, 0, 0)),         # [cx; cy; s; label]
            pl.BlockSpec((3, TILE_P), lambda b, t, n: (0, t)),             # priors
            pl.BlockSpec((None, C, TILE_P), lambda b, t, n: (b, 0, t)),    # scores
            pl.BlockSpec((None, 3, TILE_P), lambda b, t, n: (b, 0, t)),    # predicted locs
        ],
        out_specs=[
            pl.BlockSpec((None, 1, TILE_P), lambda b, t, n: (b, 0, t)),    # negatives-only CE
            pl.BlockSpec((None, 1, 8), lambda b, t, n: (b, 0, 0)),         # per-image scalars
        ],
        scratch_shapes=[pltpu.VMEM((1, 1), jnp.float32),
                        pltpu.VMEM((1, 1), jnp.float32),
                        pltpu.VMEM((1, 1), jnp.float32)])
    conf_neg3, stats3 = pl.pallas_call(
        functools.partial(_match_loss_kernel, threshold=threshold,
                          p_real=P, tile_p=TILE_P),
        grid_spec=grid_spec,
        out_shape=[jax.ShapeDtypeStruct((B, 1, P_pad), jnp.float32),
                   jax.ShapeDtypeStruct((B, 1, 8), jnp.float32)],
        compiler_params=pltpu.CompilerParams(
            dimension_semantics=("parallel", "arbitrary")),
    )(n_obj_i, boxes_f, pfo, bl4, priors_t, scores_t, pred_t)

    conf_neg = conf_neg3[:, 0, :]                 # (B, P_pad), positives & pad lanes = 0
    stats = stats3[:, 0, :]                       # (B, 8)

    # hard-negative mining via top_k (replaces the full per-row sort).
    # TODO(synk): assumes n_hard_negatives <= neg_pos_ratio*M per image (n_pos <= M);
    #             raise k_hard if the prior set / threshold can yield more positives.
    k_hard = int(min(P_pad, max(1, neg_pos_ratio * M)))
    neg_topk = jax.lax.top_k(conf_neg, k_hard)[0]                         # (B, k_hard)

    loss = pl.pallas_call(
        functools.partial(_final_loss_kernel, neg_pos_ratio=neg_pos_ratio, alpha=alpha),
        out_shape=jax.ShapeDtypeStruct((1, 1), jnp.float32),
    )(stats, neg_topk)
    return loss[0, 0]


if __name__ == "__main__":
    key = jax.random.PRNGKey(0)
    B, P, C, M = 2, 64, 8, 8   # batch, priors, classes, max objects per image

    # deterministic priors: 8x8 grid of square priors (cx, cy, side=0.2) in (0, 1)
    gx, gy = jnp.meshgrid(
        (jnp.arange(8, dtype=jnp.float32) + 0.5) / 8.0,
        (jnp.arange(8, dtype=jnp.float32) + 0.5) / 8.0,
        indexing="ij")
    priors_cxcy = jnp.stack(
        [gx.reshape(-1), gy.reshape(-1), jnp.full((P,), 0.2, jnp.float32)], axis=1)  # (P, 3)

    k1, k2, k3, k4, k5 = jax.random.split(key, 5)
    predicted_locs = jax.random.normal(k1, (B, P, 3), jnp.float32)
    predicted_scores = jax.random.normal(k2, (B, P, C), jnp.float32)
    box_centers = jax.random.uniform(k3, (B, M, 2), minval=0.2, maxval=0.8)
    box_sizes = jax.random.uniform(k4, (B, M, 1), minval=0.15, maxval=0.45)
    boxes = jnp.concatenate([box_centers, box_sizes], axis=-1).astype(jnp.float32)  # (B, M, 3)
    labels = jax.random.randint(k5, (B, M), 1, C).astype(jnp.int32)                 # (B, M)
    n_objects = jnp.array([3, 5], dtype=jnp.int32)                                  # valid boxes/image

    loss = multibox_loss(predicted_locs, predicted_scores, boxes, labels,
                         n_objects, priors_cxcy,
                         threshold=0.5, neg_pos_ratio=3, alpha=1.0)
    jax.block_until_ready(loss)
    print("KERNEL_OK")
</pallas_src>

<mosaic_0001>
module attributes {stable_mosaic.version = 11 : i64} {
  func.func @_best_prior_kernel(%arg0: i32, %arg1: i32, %arg2: memref<1x8x3xf32, #tpu.memory_space<vmem>>, %arg3: memref<3x128xf32, #tpu.memory_space<vmem>>, %arg4: memref<1x8x1xi32, #tpu.memory_space<vmem>>, %arg5: memref<8x1xf32, #tpu.memory_space<vmem>>, %arg6: memref<8x1xi32, #tpu.memory_space<vmem>>) attributes {dimension_semantics = [#tpu.dimension_semantics<parallel>, #tpu.dimension_semantics<arbitrary>], iteration_bounds = array<i64: 2, 1>, scalar_prefetch = 0 : i64, scratch_operands = 2 : i64, tpu.core_type = #tpu.core_type<tc>, window_params = [{transform_indices = @transform_0, window_bounds = array<i64: 1, 8, 3>}, {transform_indices = @transform_1, window_bounds = array<i64: 3, 128>}, {transform_indices = @transform_2, window_bounds = array<i64: 1, 8, 1>}]} {
    %c0_i32 = arith.constant 0 : i32
    %0 = arith.cmpi eq, %arg1, %c0_i32 : i32
    %1 = arith.extui %0 : i1 to i32
    %c0_i32_0 = arith.constant 0 : i32
    %2 = arith.cmpi ne, %1, %c0_i32_0 : i32
    scf.if %2 {
      %cst_29 = arith.constant -2.000000e+00 : f32
      %89 = vector.broadcast %cst_29 : f32 to vector<8x1xf32>
      %c0_30 = arith.constant 0 : index
      %c0_31 = arith.constant 0 : index
      %90 = vector.load %arg5[%c0_30, %c0_31] : memref<8x1xf32, #tpu.memory_space<vmem>>, vector<8x1xf32>
      tpu.vector_store %arg5[%c0_30, %c0_31], %89 {strides = array<i32>} : memref<8x1xf32, #tpu.memory_space<vmem>>, vector<8x1xf32>,
      %c0_i32_32 = arith.constant 0 : i32
      %91 = vector.broadcast %c0_i32_32 : i32 to vector<8x1xi32>
      %c0_33 = arith.constant 0 : index
      %c0_34 = arith.constant 0 : index
      %92 = vector.load %arg6[%c0_33, %c0_34] : memref<8x1xi32, #tpu.memory_space<vmem>>, vector<8x1xi32>
      tpu.vector_store %arg6[%c0_33, %c0_34], %91 {strides = array<i32>} : memref<8x1xi32, #tpu.memory_space<vmem>>, vector<8x1xi32>,
    } else {
    }
    %c0 = arith.constant 0 : index
    %c0_1 = arith.constant 0 : index
    %c0_2 = arith.constant 0 : index
    %3 = vector.load %arg2[%c0, %c0_1, %c0_2] : memref<1x8x3xf32, #tpu.memory_space<vmem>>, vector<1x8x3xf32>
    %4 = vector.shape_cast %3 : vector<1x8x3xf32> to vector<8x3xf32>
    %c0_3 = arith.constant 0 : index
    %c0_4 = arith.constant 0 : index
    %5 = vector.load %arg3[%c0_3, %c0_4] : memref<3x128xf32, #tpu.memory_space<vmem>>, vector<3x128xf32>
    %6 = vector.extract_strided_slice %4 {offsets = [0, 0], sizes = [8, 1], strides = [1, 1]} : vector<8x3xf32> to vector<8x1xf32>
    %7 = vector.extract_strided_slice %4 {offsets = [0, 1], sizes = [8, 1], strides = [1, 1]} : vector<8x3xf32> to vector<8x1xf32>
    %8 = vector.extract_strided_slice %4 {offsets = [0, 2], sizes = [8, 1], strides = [1, 1]} : vector<8x3xf32> to vector<8x1xf32>
    %9 = vector.extract_strided_slice %5 {offsets = [0, 0], sizes = [1, 128], strides = [1, 1]} : vector<3x128xf32> to vector<1x128xf32>
    %10 = vector.extract_strided_slice %5 {offsets = [1, 0], sizes = [1, 128], strides = [1, 1]} : vector<3x128xf32> to vector<1x128xf32>
    %11 = vector.extract_strided_slice %5 {offsets = [2, 0], sizes = [1, 128], strides = [1, 1]} : vector<3x128xf32> to vector<1x128xf32>
    %cst = arith.constant 5.000000e-01 : f32
    %12 = vector.broadcast %cst : f32 to vector<8x1xf32>
    %13 = arith.mulf %12, %8 : vector<8x1xf32>
    %14 = arith.addf %6, %13 : vector<8x1xf32>
    %cst_5 = arith.constant 5.000000e-01 : f32
    %15 = vector.broadcast %cst_5 : f32 to vector<1x128xf32>
    %16 = arith.mulf %15, %11 : vector<1x128xf32>
    %17 = arith.addf %9, %16 : vector<1x128xf32>
    %18 = vector.broadcast %14 : vector<8x1xf32> to vector<8x128xf32>
    %19 = vector.broadcast %17 : vector<1x128xf32> to vector<8x128xf32>
    %20 = arith.minimumf %18, %19 : vector<8x128xf32>
    %cst_6 = arith.constant 5.000000e-01 : f32
    %21 = vector.broadcast %cst_6 : f32 to vector<8x1xf32>
    %22 = arith.mulf %21, %8 : vector<8x1xf32>
    %23 = arith.subf %6, %22 : vector<8x1xf32>
    %cst_7 = arith.constant 5.000000e-01 : f32
    %24 = vector.broadcast %cst_7 : f32 to vector<1x128xf32>
    %25 = arith.mulf %24, %11 : vector<1x128xf32>
    %26 = arith.subf %9, %25 : vector<1x128xf32>
    %27 = vector.broadcast %23 : vector<8x1xf32> to vector<8x128xf32>
    %28 = vector.broadcast %26 : vector<1x128xf32> to vector<8x128xf32>
    %29 = arith.maximumf %27, %28 : vector<8x128xf32>
    %30 = arith.subf %20, %29 : vector<8x128xf32>
    %cst_8 = arith.constant 0.000000e+00 : f32
    %31 = vector.broadcast %cst_8 : f32 to vector<8x128xf32>
    %32 = arith.maximumf %31, %30 : vector<8x128xf32>
    %cst_9 = arith.constant 5.000000e-01 : f32
    %33 = vector.broadcast %cst_9 : f32 to vector<8x1xf32>
    %34 = arith.mulf %33, %8 : vector<8x1xf32>
    %35 = arith.addf %7, %34 : vector<8x1xf32>
    %cst_10 = arith.constant 5.000000e-01 : f32
    %36 = vector.broadcast %cst_10 : f32 to vector<1x128xf32>
    %37 = arith.mulf %36, %11 : vector<1x128xf32>
    %38 = arith.addf %10, %37 : vector<1x128xf32>
    %39 = vector.broadcast %35 : vector<8x1xf32> to vector<8x128xf32>
    %40 = vector.broadcast %38 : vector<1x128xf32> to vector<8x128xf32>
    %41 = arith.minimumf %39, %40 : vector<8x128xf32>
    %cst_11 = arith.constant 5.000000e-01 : f32
    %42 = vector.broadcast %cst_11 : f32 to vector<8x1xf32>
    %43 = arith.mulf %42, %8 : vector<8x1xf32>
    %44 = arith.subf %7, %43 : vector<8x1xf32>
    %cst_12 = arith.constant 5.000000e-01 : f32
    %45 = vector.broadcast %cst_12 : f32 to vector<1x128xf32>
    %46 = arith.mulf %45, %11 : vector<1x128xf32>
    %47 = arith.subf %10, %46 : vector<1x128xf32>
    %48 = vector.broadcast %44 : vector<8x1xf32> to vector<8x128xf32>
    %49 = vector.broadcast %47 : vector<1x128xf32> to vector<8x128xf32>
    %50 = arith.maximumf %48, %49 : vector<8x128xf32>
    %51 = arith.subf %41, %50 : vector<8x128xf32>
    %cst_13 = arith.constant 0.000000e+00 : f32
    %52 = vector.broadcast %cst_13 : f32 to vector<8x128xf32>
    %53 = arith.maximumf %52, %51 : vector<8x128xf32>
    %54 = arith.mulf %32, %53 : vector<8x128xf32>
    %55 = arith.mulf %8, %8 : vector<8x1xf32>
    %56 = arith.mulf %11, %11 : vector<1x128xf32>
    %57 = vector.broadcast %55 : vector<8x1xf32> to vector<8x128xf32>
    %58 = vector.broadcast %56 : vector<1x128xf32> to vector<8x128xf32>
    %59 = arith.addf %57, %58 : vector<8x128xf32>
    %60 = arith.subf %59, %54 : vector<8x128xf32>
    %61 = arith.divf %54, %60 : vector<8x128xf32>
    %62 = tpu.iota {dimensions = array<i32: 1>} : vector<8x128xi32>
    %c128_i32 = arith.constant 128 : i32
    %63 = arith.muli %arg1, %c128_i32 : i32
    %64 = vector.broadcast %63 : i32 to vector<8x128xi32>
    %65 = arith.addi %62, %64 : vector<8x128xi32>
    %c64_i32 = arith.constant 64 : i32
    %66 = vector.broadcast %c64_i32 : i32 to vector<8x128xi32>
    %67 = arith.cmpi slt, %65, %66 : vector<8x128xi32>
    %cst_14 = arith.constant -1.000000e+00 : f32
    %68 = vector.broadcast %cst_14 : f32 to vector<8x128xf32>
    %69 = arith.select %67, %61, %68 : vector<8x128xi1>, vector<8x128xf32>
    %cst_15 = arith.constant dense<0xFF800000> : vector<8xf32>
    %70 = vector.multi_reduction <maximumf>, %69, %cst_15 [1] : vector<8x128xf32> to vector<8xf32>
    %71 = vector.shape_cast %70 : vector<8xf32> to vector<8x1xf32>
    %72 = vector.broadcast %71 : vector<8x1xf32> to vector<8x128xf32>
    %73 = arith.cmpf oeq, %69, %72 : vector<8x128xf32>
    %c1073741824_i32 = arith.constant 1073741824 : i32
    %74 = vector.broadcast %c1073741824_i32 : i32 to vector<8x128xi32>
    %75 = arith.select %73, %65, %74 : vector<8x128xi1>, vector<8x128xi32>
    %cst_16 = arith.constant dense<2147483647> : vector<8xi32>
    %76 = vector.multi_reduction <minsi>, %75, %cst_16 [1] : vector<8x128xi32> to vector<8xi32>
    %77 = vector.shape_cast %76 : vector<8xi32> to vector<8x1xi32>
    %c0_17 = arith.constant 0 : index
    %c0_18 = arith.constant 0 : index
    %78 = vector.load %arg5[%c0_17, %c0_18] : memref<8x1xf32, #tpu.memory_space<vmem>>, vector<8x1xf32>
    %79 = arith.cmpf ogt, %71, %78 : vector<8x1xf32>
    %c0_19 = arith.constant 0 : index
    %c0_20 = arith.constant 0 : index
    %80 = vector.load %arg6[%c0_19, %c0_20] : memref<8x1xi32, #tpu.memory_space<vmem>>, vector<8x1xi32>
    %81 = arith.select %79, %77, %80 : vector<8x1xi1>, vector<8x1xi32>
    %c0_21 = arith.constant 0 : index
    %c0_22 = arith.constant 0 : index
    %82 = vector.load %arg6[%c0_21, %c0_22] : memref<8x1xi32, #tpu.memory_space<vmem>>, vector<8x1xi32>
    tpu.vector_store %arg6[%c0_21, %c0_22], %81 {strides = array<i32>} : memref<8x1xi32, #tpu.memory_space<vmem>>, vector<8x1xi32>,
    %c0_23 = arith.constant 0 : index
    %c0_24 = arith.constant 0 : index
    %83 = vector.load %arg5[%c0_23, %c0_24] : memref<8x1xf32, #tpu.memory_space<vmem>>, vector<8x1xf32>
    %84 = arith.select %79, %71, %83 : vector<8x1xi1>, vector<8x1xf32>
    %c0_25 = arith.constant 0 : index
    %c0_26 = arith.constant 0 : index
    %85 = vector.load %arg5[%c0_25, %c0_26] : memref<8x1xf32, #tpu.memory_space<vmem>>, vector<8x1xf32>
    tpu.vector_store %arg5[%c0_25, %c0_26], %84 {strides = array<i32>} : memref<8x1xf32, #tpu.memory_space<vmem>>, vector<8x1xf32>,
    %c0_i32_27 = arith.constant 0 : i32
    %86 = arith.cmpi eq, %arg1, %c0_i32_27 : i32
    %87 = arith.extui %86 : i1 to i32
    %c0_i32_28 = arith.constant 0 : i32
    %88 = arith.cmpi ne, %87, %c0_i32_28 : i32
    scf.if %88 {
      %c0_29 = arith.constant 0 : index
      %c0_30 = arith.constant 0 : index
      %89 = vector.load %arg6[%c0_29, %c0_30] : memref<8x1xi32, #tpu.memory_space<vmem>>, vector<8x1xi32>
      %c0_31 = arith.constant 0 : index
      %c0_32 = arith.constant 0 : index
      %c0_33 = arith.constant 0 : index
      %90 = vector.load %arg4[%c0_31, %c0_32, %c0_33] : memref<1x8x1xi32, #tpu.memory_space<vmem>>, vector<1x8x1xi32>
      %91 = vector.shape_cast %90 : vector<1x8x1xi32> to vector<8x1xi32>
      %92 = vector.shape_cast %89 : vector<8x1xi32> to vector<1x8x1xi32>
      tpu.vector_store %arg4[%c0_31, %c0_32, %c0_33], %92 {strides = array<i32>} : memref<1x8x1xi32, #tpu.memory_space<vmem>>, vector<1x8x1xi32>,
    } else {
    }
    return
  }
  func.func @transform_0(%arg0: i32, %arg1: i32) -> (i32, i32, i32) {
    %c0_i32 = arith.constant 0 : i32
    %c0_i32_0 = arith.constant 0 : i32
    %c0_i32_1 = arith.constant 0 : i32
    return %arg0, %c0_i32, %c0_i32_0 : i32, i32, i32
  }
  func.func @transform_1(%arg0: i32, %arg1: i32) -> (i32, i32) {
    %c0_i32 = arith.constant 0 : i32
    %c0_i32_0 = arith.constant 0 : i32
    return %c0_i32, %arg1 : i32, i32
  }
  func.func @transform_2(%arg0: i32, %arg1: i32) -> (i32, i32, i32) {
    %c0_i32 = arith.constant 0 : i32
    %c0_i32_0 = arith.constant 0 : i32
    %c0_i32_1 = arith.constant 0 : i32
    return %arg0, %c0_i32, %c0_i32_0 : i32, i32, i32
  }
}

</mosaic_0001>

<bundles_post_ra>
// kernel: tpu_custom_call.1
= control target key start
LH: loop header
LB: loop body
LE: loop exit
PB: predicated region body
PF: predicated region fallthrough
CT: control target
= control target key end

     0   :  { %s467_s9 = smov 0   ;;  %s469_s10 = smov 0   ;;  %s517_s0 = inlined_call_operand.vmem [shape: f32[2,8,3], index: 0, kind: input, shape index: {}]   ;;  %s518_s1 = inlined_call_operand.vmem [shape: f32[3,128], index: 1, kind: input, shape index: {}]   ;;  %s519_s2 = inlined_call_operand.vmem [shape: s32[2,8,1], index: 2, kind: output, shape index: {}]  }
   0x1   :  { %s471_s11 = smov 0  }
   0x2 LB: > { %s24_s12 = sadd.s32 1, %s440_s10  ;;  %p380_p0 = scmp.ge.s32.totalorder %s444_s11, 1  ;;  %s444_s11 = sphi %s471_s11, %s12_s11   ;;  %s440_s10 = sphi %s469_s10, %s521_s10   ;;  %s436_s9 = sphi %s467_s9, %s520_s9  }
   0x3   : > { %p26_p1 = scmp.ge.s32.totalorder %s24_s12, 2  ;;  %p132_p2 = scmp.lt.s32.totalorder %s444_s11, 3 }
   0x5   : > { %s523_s12 = smov (%p26_p1, %s24_s12), 0  ;;  %p133_p3 = pnand %p380_p0, %p132_p2 }
   0x6   : > { %p156_p4 = scmp.lt.s32.totalorder (!%p133_p3), %s436_s9, 1  ;;  %vm172_vm0 = vcmask (!%p133_p3), 7168   ;;  %v446_v0 = vmov (!%p133_p3), 0   ;;  %v447_v1 = vmov (!%p133_p3), -2.0   ;;  %v448_v2 = vmov (!%p133_p3), 1   ;;  %s449_s17 = smov (!%p133_p3), 126  }
   0x7   : > { %136 = sbr.rel (%p133_p3) target bundleno = 746 (0x2ea), region = 28  ;;  %415 = vset.pattern.permute.xlu1 (!%p133_p3), %v446_v0  ;;  %173 = vst.msk [vmem:[#allocation2] sm:$0xff] (!%p133_p3), %vm172_vm0, %v447_v1  ;;  %174 = vst.msk [vmem:[#allocation3] sm:$0xff] (!%p133_p3), %vm172_vm0, %v446_v0  ;;  %416 = vset.pattern.permute.xlu0 (!%p133_p3), %v448_v2  ;;  %s450_s18 = smov (!%p133_p3), 127   ;;  %v451_v11 = vmov (!%p133_p3), 2   ;;  %v193_v15 = vlaneseq (!%p133_p3) }
   0x8   : > { %v176_v13 = vld [vmem:[%s518_s1] sm:$0x7] (!%p133_p3) }
   0x9   : > { %v183_v14 = vmul.f32 (!%p133_p3), 0.5, %v176_v13  ;;  %v194_v17 = vshrl.u32 (!%p133_p3), %v193_v15, 7  ;;  %v245_v33 = vmul.f32 (!%p133_p3), %v176_v13, %v176_v13  ;;  %v260_v48 = vand.u32 (!%p133_p3), 127, %v193_v15 }
   0xb   : > { %v185_v16 = vrot.slane (!%p133_p3), %v183_v14, 2  ;;  %v216_v18 = vrot.slane (!%p133_p3), %v183_v14, 1  ;;  %v195_v21 = vsub.s32 (!%p133_p3), 0, %v194_v17  ;;  %v226_v24 = vsub.s32 (!%p133_p3), 1, %v194_v17 }
   0xc   : > { %v253_v34 = vsub.s32 (!%p133_p3), 2, %v194_v17  ;;  %vm264_vm1 = vcmp.lt.s32.totalorder (!%p133_p3), %v260_v48, 64 }
   0xd   : > { %v199_v19 = vsub.f32 (!%p133_p3), %v176_v13, %v185_v16  ;;  %v187_v20 = vadd.f32 (!%p133_p3), %v185_v16, %v176_v13  ;;  %v218_v23 = vadd.f32 (!%p133_p3), %v216_v18, %v176_v13  ;;  %v230_v26 = vsub.f32 (!%p133_p3), %v176_v13, %v216_v18 }
   0xe   : > { %s525_s9 = smov (!%p156_p4, %s436_s9), 1  ;;  %v254_v40 = vrot.slane %v245_v33, %v253_v34  ;;  %v284_v52 = vld [vmem:[#allocation2] sm:$0xff] }
   0xf   : > { %s381_s13 = sshll.u32 %s525_s9, 3  ;;  %v208_v25 = vrot.slane %v199_v19, %v195_v21  ;;  %v196_v27 = vrot.slane %v187_v20, %v195_v21  ;;  %v227_v29 = vrot.slane %v218_v23, %v226_v24  ;;  %v239_v32 = vrot.slane %v230_v26, %v226_v24 }
  0x10   : > { %s159_s16 = scalar_lea.vmem %s517_s0, %s381_s13  ;;  %s167_s23 = scalar_lea.vmem %s519_s2, %s381_s13 }
  0x11   : > { %v175_v3 = vld [vmem:[%s159_s16] sm:$0xff] }
  0x12   : > { %v177_v4 = vmul.f32 0.5, %v175_v3  ;;  %v244_v12 = vmul.f32 %v175_v3, %v175_v3 }
  0x14   : > { %179 = vrot.lane.b32.xlu0 %v177_v4, %s449_s17 }
  0x18   : > { %212 = vrot.lane.b32.xlu0 %v177_v4, %s450_s18 }
  0x86   : > { %v180_v5 = vpop.permute.xlu0 %179 }
  0x87   : > { %v182_v6 = vadd.f32 %v180_v5, %v175_v3  ;;  %v198_v8 = vsub.f32 %v175_v3, %v180_v5 }
  0x89   : > { %190 = vperm.xlu1 %415, %v182_v6  }
  0x8a   : > { %v213_v7 = vpop.permute.xlu0 %212 }
  0x8b   : > { %v215_v9 = vadd.f32 %v213_v7, %v175_v3  ;;  %v229_v10 = vsub.f32 %v175_v3, %v213_v7 }
  0x8d   : > { %202 = vperm.xlu1 %415, %v198_v8   ;;  %221 = vperm.xlu0 %416, %v215_v9  }
  0x91   : > { %417 = vset.pattern.permute.xlu1 %v448_v2  ;;  %419 = vset.pattern.permute.xlu0 %v451_v11  ;;  %v286_v2 = vld [vmem:[#allocation3] sm:$0xff] }
  0x92   : > { %233 = vperm.xlu1 %417, %v229_v10  }
  0x96   : > { %418 = vset.pattern.permute.xlu1 %v451_v11 }
  0x97   : > { %248 = vperm.xlu1 %418, %v244_v12  }
 0x108   : > { %v191_v22 = vpop.permute.xlu1 %190 }
 0x109   : > { %v197_v35 = vmin.f32 %v191_v22, %v196_v27 }
 0x10c   : > { %v203_v28 = vpop.permute.xlu1 %202  ;;  %v222_v30 = vpop.permute.xlu0 %221 }
 0x10d   : > { %v209_v31 = vmax.f32 %v203_v28, %v208_v25  ;;  %v228_v36 = vmin.f32 %v222_v30, %v227_v29 }
 0x10f   : > { %v210_v38 = vsub.f32 %v197_v35, %v209_v31 }
 0x111   : > { %v234_v37 = vpop.permute.xlu1 %233  ;;  %v211_v42 = vmax.f32 %v210_v38, 0.0 }
 0x112   : > { %v240_v39 = vmax.f32 %v234_v37, %v239_v32 }
 0x114   : > { %v241_v41 = vsub.f32 %v228_v36, %v240_v39 }
 0x116   : > { %v242_v43 = vmax.f32 %v241_v41, 0.0  ;;  %v249_v44 = vpop.permute.xlu1 %248 }
 0x117   : > { %v255_v45 = vadd.f32 %v254_v40, %v249_v44 }
 0x118   : > { %v243_v46 = vmul.f32 %v242_v43, %v211_v42 }
 0x11a   : > { %v256_v47 = vsub.f32 %v255_v45, %v243_v46 }
 0x11c   : > { %420 = vrcp.f32 %v256_v47 }
 0x126   : > { %v421_v49 = vpop.eup %420 }
 0x127   : > { %v258_v50 = vmul.f32 %v421_v49, %v243_v46 }
 0x129   : > { %v265_v51 = vsel %vm264_vm1, %v258_v50, -1.0 }
 0x12a   : > { %266 = vmax.xlane.f32.xlu0 %v265_v51 }
 0x1b7   : > { %v267_v53 = vpop.xlane.xlu0 %266 }
 0x1b8   : > { %vm268_vm2 = vcmp.eq.f32.partialorder %v265_v51, %v267_v53  ;;  %vm285_vm3 = vcmp.gt.f32.partialorder %v267_v53, %v284_v52 }
 0x1b9   : > { %v291_v54 = vsel %vm285_vm3, %v267_v53, %v284_v52  ;;  %v269_v55 = vsel %vm268_vm2, %v260_v48, 1073741824 }
 0x1ba   : > { %292 = vst.msk [vmem:[#allocation2] sm:$0xff] %vm172_vm0, %v291_v54  ;;  %v271_v56 = vshra.s32 %v269_v55, 16  ;;  %v270_v58 = vand.u32 65535, %v269_v55 }
 0x1bc   : > { %v273_v57 = vcvt.s32.f32 %v271_v56  ;;  %v272_v60 = vcvt.s32.f32 %v270_v58 }
 0x1be   : > { %274 = vmin.xlane.f32.xlu1 %v273_v57 }
 0x24b   : > { %v275_v59 = vpop.xlane.xlu1 %274 }
 0x24c   : > { %vm276_vm4 = vcmp.eq.f32.partialorder %v273_v57, %v275_v59  ;;  %v281_v62 = vcvt.f32.s32 %v275_v59 }
 0x24d   : > { %v277_v61 = vsel %vm276_vm4, %v272_v60, inf }
 0x24e   : > { %278 = vmin.xlane.f32.xlu0 %v277_v61  ;;  %v282_v0 = vshll.u32 %v281_v62, 16 }
 0x2db   : > { %v279_v63 = vpop.xlane.xlu0 %278 }
 0x2dc   : > { %v280_v1 = vcvt.f32.s32 %v279_v63 }
 0x2de   : > { %v283_v3 = vadd.s32 %v282_v0, %v280_v1 }
 0x2e0   : > { %v287_v4 = vsel %vm285_vm3, %v283_v3, %v286_v2 }
 0x2e1   : > { %289 = vst.msk [vmem:[#allocation3] sm:$0xff] %vm172_vm0, %v287_v4 }
 0x2e8   : > { %v296_v5 = vld [vmem:[#allocation3] sm:$0xff] }
 0x2e9   : > { %297 = vst.msk [vmem:[%s167_s23] sm:$0xff] %vm172_vm0, %v296_v5 }
 0x2ea PF: > { %s12_s11 = sadd.s32 1, %s444_s11   ;;  %s520_s9 = smov %s440_s10 }
 0x2eb   : > { %p9_p5 = scmp.ge.s32.totalorder %s12_s11, 4   ;;  %s521_s10 = smov %s523_s12 }
 0x2ed   :  { %11 = sbr.rel (!%p9_p5) target bundleno = 2 (0x2), region = 69 }

</bundles_post_ra>
